<compile_context>
chip_gen: v7x
topology: tpu7x:2x2x1
jax: 0.10.0
libtpu: 0.0.40
codegen_flags: <defaults>
</compile_context>

<pallas_src>
import numpy as np
import jax
import jax.numpy as jnp
from jax.experimental import pallas as pl
from jax.experimental.pallas import tpu as pltpu

# CLIP constants (times 255, as in the module), baked in as Python floats.
_CLIP_MEAN = tuple(255.0 * m for m in (0.48145466, 0.4578275, 0.40821073))
_CLIP_STD = tuple(255.0 * s for s in (0.26862954, 0.26130258, 0.27577711))
_CLIP_INV_STD = tuple(1.0 / s for s in _CLIP_STD)

_A = -0.75  # PyTorch bicubic coefficient


def _cubic_w(x, a=_A):
    """Cubic convolution kernel weight for distance x >= 0 (PyTorch convention)."""
    x = float(abs(x))
    if x <= 1.0:
        return ((a + 2.0) * x - (a + 3.0)) * x * x + 1.0
    elif x < 2.0:
        return (((x - 5.0) * x + 8.0) * x - 4.0) * a
    return 0.0


def _bicubic_matrix(in_size: int, out_size: int) -> np.ndarray:
    """(out_size, in_size) interpolation matrix matching F.interpolate(mode='bicubic',
    align_corners=True), with border-clamped sample indices."""
    m = np.zeros((out_size, in_size), dtype=np.float64)
    scale = (in_size - 1) / (out_size - 1) if out_size > 1 else 0.0
    for i in range(out_size):
        src = i * scale
        i0 = int(np.floor(src))
        t = src - i0
        idxs = (i0 - 1, i0, i0 + 1, i0 + 2)
        ws = (_cubic_w(1.0 + t), _cubic_w(t), _cubic_w(1.0 - t), _cubic_w(2.0 - t))
        for idx, w in zip(idxs, ws):
            idx = min(max(idx, 0), in_size - 1)  # border clamp (accumulate)
            m[i, idx] += w
    return m.astype(np.float32)


def _make_kernel(C: int, H: int, res: int):
    def kernel(x_ref, wh_ref, wwt_ref, o_ref):
        # x_ref:  (C*H, W)   f32 — all channels of one image, channels folded
        #                         into the sublane axis (no relayout needed).
        # wh_ref: (res, H)   f32
        # wwt_ref:(W, res)   f32 (already transposed at trace time)
        # o_ref:  (C, res, res) f32
        wh = wh_ref[...]

        # Column pass for all channels at once: (C*H, W) @ (W, res) -> (C*H, res).
        # Single large-M matmul => minimal MXU padding waste, no concatenate.
        t = jnp.dot(x_ref[...], wwt_ref[...], preferred_element_type=jnp.float32)

        for c in range(C):
            # Row pass per channel: (res, H) @ (H, res) -> (res, res).
            # Static, H-aligned sublane slice of an in-register value.
            yc = jnp.dot(wh, t[c * H:(c + 1) * H, :],
                         preferred_element_type=jnp.float32)
            # Scale to [0,255], clamp, round (round-half-to-even == torch.round).
            yc = jnp.round(jnp.clip(yc * 127.5 + 128.0, 0.0, 255.0))
            # Per-channel CLIP normalization with compile-time scalar constants
            # (multiply by 1/std instead of divide); store straight to output.
            o_ref[c, :, :] = (yc - _CLIP_MEAN[c]) * _CLIP_INV_STD[c]

    return kernel


def clip_preprocess(x: jax.Array, res: int) -> jax.Array:
    """x: (B, 3, H, W) float32 in roughly [-1, 1] -> (B, 3, res, res) float32."""
    B, C, H, W = x.shape
    assert C == 3, "ClipPreprocess expects 3 channels"

    wh = jnp.asarray(_bicubic_matrix(H, res))      # (res, H)
    wwt = jnp.asarray(_bicubic_matrix(W, res).T)   # (W, res) -- transposed at trace time

    # Free row-major metadata reshape: fold channels into the row (sublane) axis.
    x2 = x.reshape(B, C * H, W)

    # Per-step VMEM footprint: double-buffered in/out blocks + weights + live values.
    io_block_bytes = 4 * (C * H * W + C * res * res)
    weight_bytes = 4 * (res * H + W * res)
    interm_bytes = 4 * (C * H * res + C * res * res)
    need = 2 * io_block_bytes + 2 * weight_bytes + 2 * interm_bytes + (8 << 20)
    vmem_limit = int(min(max(need, 32 << 20), 48 << 20))  # fits v7x's 64 MiB VMEM

    return pl.pallas_call(
        _make_kernel(C, H, res),
        out_shape=jax.ShapeDtypeStruct((B, C, res, res), jnp.float32),
        grid_spec=pltpu.PrefetchScalarGridSpec(
            num_scalar_prefetch=0,
            grid=(B,),
            in_specs=[
                pl.BlockSpec((pl.Squeezed(), C * H, W),
                             lambda b: (b, 0, 0)),           # one image, all channels
                pl.BlockSpec((res, H), lambda b: (0, 0)),    # Wh   (replicated)
                pl.BlockSpec((W, res), lambda b: (0, 0)),    # Ww^T (replicated)
            ],
            out_specs=pl.BlockSpec((pl.Squeezed(), C, res, res),
                                   lambda b: (b, 0, 0, 0)),
        ),
        compiler_params=pltpu.CompilerParams(
            dimension_semantics=("parallel",),
            vmem_limit_bytes=vmem_limit),
    )(x2, wh, wwt)


def _reference(x: jax.Array, res: int) -> jax.Array:
    """Pure-JAX reference using the same separable-bicubic formulation."""
    B, C, H, W = x.shape
    wh = jnp.asarray(_bicubic_matrix(H, res))
    ww = jnp.asarray(_bicubic_matrix(W, res))
    y = jnp.einsum("oh,bchw->bcow", wh, x)
    y = jnp.einsum("pw,bcow->bcop", ww, y)
    y = jnp.round(jnp.clip(y * 127.5 + 128.0, 0.0, 255.0))
    mean = jnp.asarray(np.array(_CLIP_MEAN, dtype=np.float32))[None, :, None, None]
    std = jnp.asarray(np.array(_CLIP_STD, dtype=np.float32))[None, :, None, None]
    return (y - mean) / std


if __name__ == "__main__":
    key = jax.random.PRNGKey(0)
    B, C, H, W = 2, 3, 16, 16
    res = 8
    # Inputs roughly in [-1, 1] (as the *127.5 + 128 rescale implies).
    x = jax.random.uniform(key, (B, C, H, W), dtype=jnp.float32, minval=-1.0, maxval=1.0)

    out = clip_preprocess(x, res)
    out = jax.block_until_ready(out)

    ref = jax.block_until_ready(_reference(x, res))
    assert out.shape == (B, C, res, res)
    assert jnp.allclose(out, ref, atol=1e-4, rtol=1e-4)

    print("KERNEL_OK")
</pallas_src>

<mosaic_0001>
module attributes {stable_mosaic.version = 11 : i64} {
  func.func @kernel(%arg0: i32, %arg1: memref<1x48x16xf32, #tpu.memory_space<vmem>>, %arg2: memref<8x16xf32, #tpu.memory_space<vmem>>, %arg3: memref<16x8xf32, #tpu.memory_space<vmem>>, %arg4: memref<1x3x8x8xf32, #tpu.memory_space<vmem>>) attributes {dimension_semantics = [#tpu.dimension_semantics<parallel>], iteration_bounds = array<i64: 2>, scalar_prefetch = 0 : i64, scratch_operands = 0 : i64, tpu.core_type = #tpu.core_type<tc>, window_params = [{transform_indices = @transform_0, window_bounds = array<i64: 1, 48, 16>}, {pipeline_mode = #tpu.pipeline_mode<synchronous>, transform_indices = @transform_1, window_bounds = array<i64: 8, 16>}, {pipeline_mode = #tpu.pipeline_mode<synchronous>, transform_indices = @transform_2, window_bounds = array<i64: 16, 8>}, {transform_indices = @transform_3, window_bounds = array<i64: 1, 3, 8, 8>}]} {
    %c0 = arith.constant 0 : index
    %c0_0 = arith.constant 0 : index
    %0 = vector.load %arg2[%c0, %c0_0] : memref<8x16xf32, #tpu.memory_space<vmem>>, vector<8x16xf32>
    %c0_1 = arith.constant 0 : index
    %c0_2 = arith.constant 0 : index
    %c0_3 = arith.constant 0 : index
    %1 = vector.load %arg1[%c0_1, %c0_2, %c0_3] : memref<1x48x16xf32, #tpu.memory_space<vmem>>, vector<1x48x16xf32>
    %2 = vector.shape_cast %1 : vector<1x48x16xf32> to vector<48x16xf32>
    %c0_4 = arith.constant 0 : index
    %c0_5 = arith.constant 0 : index
    %3 = vector.load %arg3[%c0_4, %c0_5] : memref<16x8xf32, #tpu.memory_space<vmem>>, vector<16x8xf32>
    %cst = arith.constant dense<0.000000e+00> : vector<48x8xf32>
    %4 = tpu.matmul %2, %3, %cst {dimension_numbers = #tpu.dot_dimension_numbers<[1], [0], [0], [1], [0, 0, 1, 1], [], []>} : vector<48x16xf32>, vector<16x8xf32>, vector<48x8xf32> -> vector<48x8xf32>
    %5 = vector.extract_strided_slice %4 {offsets = [0, 0], sizes = [16, 8], strides = [1, 1]} : vector<48x8xf32> to vector<16x8xf32>
    %cst_6 = arith.constant dense<0.000000e+00> : vector<8x8xf32>
    %6 = tpu.matmul %0, %5, %cst_6 {dimension_numbers = #tpu.dot_dimension_numbers<[1], [0], [0], [1], [0, 0, 1, 1], [], []>} : vector<8x16xf32>, vector<16x8xf32>, vector<8x8xf32> -> vector<8x8xf32>
    %cst_7 = arith.constant 1.275000e+02 : f32
    %7 = vector.broadcast %cst_7 : f32 to vector<8x8xf32>
    %8 = arith.mulf %6, %7 : vector<8x8xf32>
    %cst_8 = arith.constant 1.280000e+02 : f32
    %9 = vector.broadcast %cst_8 : f32 to vector<8x8xf32>
    %10 = arith.addf %8, %9 : vector<8x8xf32>
    %cst_9 = arith.constant 0.000000e+00 : f32
    %cst_10 = arith.constant 2.550000e+02 : f32
    %11 = vector.broadcast %cst_9 : f32 to vector<8x8xf32>
    %12 = arith.maximumf %11, %10 : vector<8x8xf32>
    %13 = vector.broadcast %cst_10 : f32 to vector<8x8xf32>
    %14 = arith.minimumf %13, %12 : vector<8x8xf32>
    %15 = math.roundeven %14 : vector<8x8xf32>
    %cst_11 = arith.constant 122.770935 : f32
    %16 = vector.broadcast %cst_11 : f32 to vector<8x8xf32>
    %17 = arith.subf %15, %16 : vector<8x8xf32>
    %cst_12 = arith.constant 0.0145984264 : f32
    %18 = vector.broadcast %cst_12 : f32 to vector<8x8xf32>
    %19 = arith.mulf %17, %18 : vector<8x8xf32>
    %c0_13 = arith.constant 0 : index
    %c0_14 = arith.constant 0 : index
    %c0_15 = arith.constant 0 : index
    %c0_16 = arith.constant 0 : index
    %20 = vector.load %arg4[%c0_13, %c0_14, %c0_15, %c0_16] : memref<1x3x8x8xf32, #tpu.memory_space<vmem>>, vector<1x1x8x8xf32>
    %21 = vector.shape_cast %20 : vector<1x1x8x8xf32> to vector<8x8xf32>
    %22 = vector.shape_cast %19 : vector<8x8xf32> to vector<1x1x8x8xf32>
    tpu.vector_store %arg4[%c0_13, %c0_14, %c0_15, %c0_16], %22 {strides = array<i32>} : memref<1x3x8x8xf32, #tpu.memory_space<vmem>>, vector<1x1x8x8xf32>,
    %23 = vector.extract_strided_slice %4 {offsets = [16, 0], sizes = [16, 8], strides = [1, 1]} : vector<48x8xf32> to vector<16x8xf32>
    %cst_17 = arith.constant dense<0.000000e+00> : vector<8x8xf32>
    %24 = tpu.matmul %0, %23, %cst_17 {dimension_numbers = #tpu.dot_dimension_numbers<[1], [0], [0], [1], [0, 0, 1, 1], [], []>} : vector<8x16xf32>, vector<16x8xf32>, vector<8x8xf32> -> vector<8x8xf32>
    %cst_18 = arith.constant 1.275000e+02 : f32
    %25 = vector.broadcast %cst_18 : f32 to vector<8x8xf32>
    %26 = arith.mulf %24, %25 : vector<8x8xf32>
    %cst_19 = arith.constant 1.280000e+02 : f32
    %27 = vector.broadcast %cst_19 : f32 to vector<8x8xf32>
    %28 = arith.addf %26, %27 : vector<8x8xf32>
    %cst_20 = arith.constant 0.000000e+00 : f32
    %cst_21 = arith.constant 2.550000e+02 : f32
    %29 = vector.broadcast %cst_20 : f32 to vector<8x8xf32>
    %30 = arith.maximumf %29, %28 : vector<8x8xf32>
    %31 = vector.broadcast %cst_21 : f32 to vector<8x8xf32>
    %32 = arith.minimumf %31, %30 : vector<8x8xf32>
    %33 = math.roundeven %32 : vector<8x8xf32>
    %cst_22 = arith.constant 116.74601 : f32
    %34 = vector.broadcast %cst_22 : f32 to vector<8x8xf32>
    %35 = arith.subf %33, %34 : vector<8x8xf32>
    %cst_23 = arith.constant 0.0150077688 : f32
    %36 = vector.broadcast %cst_23 : f32 to vector<8x8xf32>
    %37 = arith.mulf %35, %36 : vector<8x8xf32>
    %c0_24 = arith.constant 0 : index
    %c1 = arith.constant 1 : index
    %c0_25 = arith.constant 0 : index
    %c0_26 = arith.constant 0 : index
    %38 = vector.load %arg4[%c0_24, %c1, %c0_25, %c0_26] : memref<1x3x8x8xf32, #tpu.memory_space<vmem>>, vector<1x1x8x8xf32>
    %39 = vector.shape_cast %38 : vector<1x1x8x8xf32> to vector<8x8xf32>
    %40 = vector.shape_cast %37 : vector<8x8xf32> to vector<1x1x8x8xf32>
    tpu.vector_store %arg4[%c0_24, %c1, %c0_25, %c0_26], %40 {strides = array<i32>} : memref<1x3x8x8xf32, #tpu.memory_space<vmem>>, vector<1x1x8x8xf32>,
    %41 = vector.extract_strided_slice %4 {offsets = [32, 0], sizes = [16, 8], strides = [1, 1]} : vector<48x8xf32> to vector<16x8xf32>
    %cst_27 = arith.constant dense<0.000000e+00> : vector<8x8xf32>
    %42 = tpu.matmul %0, %41, %cst_27 {dimension_numbers = #tpu.dot_dimension_numbers<[1], [0], [0], [1], [0, 0, 1, 1], [], []>} : vector<8x16xf32>, vector<16x8xf32>, vector<8x8xf32> -> vector<8x8xf32>
    %cst_28 = arith.constant 1.275000e+02 : f32
    %43 = vector.broadcast %cst_28 : f32 to vector<8x8xf32>
    %44 = arith.mulf %42, %43 : vector<8x8xf32>
    %cst_29 = arith.constant 1.280000e+02 : f32
    %45 = vector.broadcast %cst_29 : f32 to vector<8x8xf32>
    %46 = arith.addf %44, %45 : vector<8x8xf32>
    %cst_30 = arith.constant 0.000000e+00 : f32
    %cst_31 = arith.constant 2.550000e+02 : f32
    %47 = vector.broadcast %cst_30 : f32 to vector<8x8xf32>
    %48 = arith.maximumf %47, %46 : vector<8x8xf32>
    %49 = vector.broadcast %cst_31 : f32 to vector<8x8xf32>
    %50 = arith.minimumf %49, %48 : vector<8x8xf32>
    %51 = math.roundeven %50 : vector<8x8xf32>
    %cst_32 = arith.constant 104.093735 : f32
    %52 = vector.broadcast %cst_32 : f32 to vector<8x8xf32>
    %53 = arith.subf %51, %52 : vector<8x8xf32>
    %cst_33 = arith.constant 0.0142200654 : f32
    %54 = vector.broadcast %cst_33 : f32 to vector<8x8xf32>
    %55 = arith.mulf %53, %54 : vector<8x8xf32>
    %c0_34 = arith.constant 0 : index
    %c2 = arith.constant 2 : index
    %c0_35 = arith.constant 0 : index
    %c0_36 = arith.constant 0 : index
    %56 = vector.load %arg4[%c0_34, %c2, %c0_35, %c0_36] : memref<1x3x8x8xf32, #tpu.memory_space<vmem>>, vector<1x1x8x8xf32>
    %57 = vector.shape_cast %56 : vector<1x1x8x8xf32> to vector<8x8xf32>
    %58 = vector.shape_cast %55 : vector<8x8xf32> to vector<1x1x8x8xf32>
    tpu.vector_store %arg4[%c0_34, %c2, %c0_35, %c0_36], %58 {strides = array<i32>} : memref<1x3x8x8xf32, #tpu.memory_space<vmem>>, vector<1x1x8x8xf32>,
    return
  }
  func.func @transform_0(%arg0: i32) -> (i32, i32, i32) {
    %c0_i32 = arith.constant 0 : i32
    %c0_i32_0 = arith.constant 0 : i32
    %c0_i32_1 = arith.constant 0 : i32
    return %arg0, %c0_i32, %c0_i32_0 : i32, i32, i32
  }
  func.func @transform_1(%arg0: i32) -> (i32, i32) {
    %c0_i32 = arith.constant 0 : i32
    %c0_i32_0 = arith.constant 0 : i32
    %c0_i32_1 = arith.constant 0 : i32
    return %c0_i32, %c0_i32_0 : i32, i32
  }
  func.func @transform_2(%arg0: i32) -> (i32, i32) {
    %c0_i32 = arith.constant 0 : i32
    %c0_i32_0 = arith.constant 0 : i32
    %c0_i32_1 = arith.constant 0 : i32
    return %c0_i32, %c0_i32_0 : i32, i32
  }
  func.func @transform_3(%arg0: i32) -> (i32, i32, i32, i32) {
    %c0_i32 = arith.constant 0 : i32
    %c0_i32_0 = arith.constant 0 : i32
    %c0_i32_1 = arith.constant 0 : i32
    %c0_i32_2 = arith.constant 0 : i32
    return %arg0, %c0_i32, %c0_i32_0, %c0_i32_1 : i32, i32, i32, i32
  }
}

</mosaic_0001>

<bundles_post_ra>
// kernel: tpu_custom_call.1
= control target key start
LH: loop header
LB: loop body
LE: loop exit
PB: predicated region body
PF: predicated region fallthrough
CT: control target
= control target key end

     0   :  { %8 = vsyncpa [#allocation3], 0  ;;  %s965_s0 = inlined_call_operand.vmem [shape: f32[2,48,16], index: 0, kind: input, shape index: {}]   ;;  %s966_s1 = inlined_call_operand.vmem [shape: f32[8,16], index: 1, kind: input, shape index: {}]   ;;  %s967_s2 = inlined_call_operand.vmem [shape: f32[16,8], index: 2, kind: input, shape index: {}]   ;;  %s968_s3 = inlined_call_operand.hbm [shape: f32[2,3,8,8], index: 3, kind: output, shape index: {}]  }
   0x1   :  { %10 = vsyncpa [#allocation3 + $0x1], 0  ;;  %s834_s12 = smov 0   ;;  %s836_s13 = smov 0  }
   0x2   :  { %s838_s14 = smov 0   ;;  %s840_s15 = smov 0  }
   0x3 LB: > { %s855_s16 = sadd.s32 4294967295, %s806_s15   ;;  %s608_s17 = sadd.s32 4294967294, %s806_s15   ;;  %s806_s15 = sphi %s840_s15, %s974_s15   ;;  %s802_s14 = sphi %s838_s14, %s973_s14   ;;  %s798_s13 = sphi %s836_s13, %s972_s13   ;;  %s794_s12 = sphi %s834_s12, %s971_s12  }
   0x4   : > { %s859_s18 = sadd.s32 1, %s806_s15   ;;  %s91_s19 = sadd.s32 1, %s802_s14 }
   0x5   : > { %s88_s20 = ssub.s32 %s806_s15, %s859_s18  ;;  %p101_p0 = scmp.ne.s32.totalorder %s802_s14, %s798_s13 }
   0x6   : > { %p89_p1 = scmp.eq.s32.totalorder %s88_s20, 0  ;;  %p102_p2 = scmp.eq.s32.totalorder %s855_s16, 1 }
   0x7   : > { %p107_p3 = scmp.ne.s32.totalorder %s798_s13, %s794_s12  ;;  %p108_p4 = scmp.eq.s32.totalorder %s608_s17, 1 }
   0x8   : > { %s870_s21 = scalar_select %p89_p1, %s802_s14, %s91_s19  }
   0x9   : > { %p872_p5 = por %p102_p2, %p101_p0  ;;  %p876_p6 = por %p108_p4, %p107_p3 }
   0xa   : > { %p611_p7 = scmp.ge.s32.totalorder %s806_s15, 1  ;;  %p140_p8 = scmp.lt.s32.totalorder %s806_s15, 3 }
   0xc   : > { %p141_p9 = pnand %p611_p7, %p140_p8 }
   0xd   : > { %v176_v0 = vld [vmem:[%s967_s2] sm:$0xff] (!%p141_p9)  ;;  %v177_v1 = vld [vmem:[%s967_s2 + $0x8] sm:$0xff] (!%p141_p9)  ;;  %p164_p10 = scmp.lt.s32.totalorder (!%p141_p9), %s855_s16, 1  ;;  %vm178_vm0 = vcmask (!%p141_p9), 130048   ;;  %v808_v9 = vmov (!%p141_p9), 0.0|0.0   ;;  %vm809_vm1 = vmmov (!%p141_p9), 0  }
   0xe   : > { %144 = sbr.rel (%p141_p9) target bundleno = 495 (0x1ef), region = 32  ;;  %v681_v2 = vpack.c.bf16 (!%p141_p9), %v177_v1, %v176_v0  ;;  %685 = vmatprep.subr.bf16.mxu1 (!%p141_p9), %v808_v9  ;;  %v810_v10 = vmov (!%p141_p9), 0.0   ;;  %v169_v15 = vld [vmem:[%s966_s1] sm:$0xff] (!%p141_p9)  ;;  %s161_s8 = sand.u32 (!%p141_p9), 1, %s798_s13   ;;  %vm372_vm2 = vcmask (!%p141_p9), 64512  }
   0xf   : > { %664 = vmatprep.mubr.msk.f32.mxu1 (!%p141_p9), %vm809_vm1, %v810_v10  ;;  %s694_s9 = smul.u32 (!%p141_p9), 24, %s161_s8  ;;  %s811_s26 = smov (!%p141_p9), [#allocation2]  }
  0x10   : > { %682 = vmatprep.subr.bf16.mxu0 (!%p141_p9), %v681_v2  ;;  %s699_s11 = smul.u32 (!%p141_p9), 384, %s855_s16  ;;  %s748_s27 = sshll.u32 (!%p141_p9), %s811_s26, 4  ;;  %s749_s27 = int_to_ptr.vmem [resolvable:$false] %s748_s27 }
  0x11   : > { %684 = vmatpush3.bf16.msra.mxu0 (!%p141_p9), %v681_v2  ;;  %s163_s10 = scalar_lea.vmem (!%p141_p9), [#allocation2], %s694_s9 }
  0x12   : > { %s546_s17 = sshll.u32 (!%p141_p9), %s163_s10, 4  ;;  %s917_s24 = scalar_lea.hbm (!%p141_p9), %s968_s3, %s699_s11  ;;  %s919_s17 = int_to_ptr.vmem [resolvable:$true] %s546_s17 }
  0x13   : > { %s744_s25 = scalar_lea.vmem (!%p141_p9), %s919_s17, 384  ;;  %p751_p0 = scmp.lt.s32.totalorder (!%p141_p9), %s919_s17, %s749_s27 }
  0x14   : > { %p745_p11 = scmp.ne.s32.totalorder (!%p141_p9), %s919_s17, %s744_s25 }
  0x15   : > { %s165_s28 = scalar_select %p164_p10, %s855_s16, 1 }
  0x16   : > { %s924_s16 = scalar_lea.sflag [#allocation3], %s161_s8  ;;  %p746_p12 = pnand %p745_p11, %p872_p5 }
  0x17   : > { %s695_s29 = smul.u32 48, %s165_s28  ;;  %s750_s28 = scalar_lea.vmem %s749_s27, 768 }
  0x18   : > { %p747_p13 = pneg %p746_p12  ;;  %p752_p1 = scmp.lt.s32.totalorder %s750_s28, %s744_s25 }
  0x19   : > { %s168_s5 = scalar_lea.vmem %s965_s0, %s695_s29 }
  0x1a   : > { %v170_v3 = vld [vmem:[%s168_s5] sm:$0xff]  ;;  %v171_v4 = vld [vmem:[%s168_s5 + $0x8] sm:$0xff]  ;;  %v172_v5 = vld [vmem:[%s168_s5 + $0x10] sm:$0xff]  ;;  %p753_p2 = por %p752_p1, %p751_p0 }
  0x1b   : > { %651 = vmatprep.mubr.msk.f32.mxu0 %vm178_vm0, %v170_v3  ;;  %v173_v6 = vld [vmem:[%s168_s5 + $0x18] sm:$0xff]  ;;  %v174_v7 = vld [vmem:[%s168_s5 + $0x20] sm:$0xff]  ;;  %v175_v8 = vld [vmem:[%s168_s5 + $0x28] sm:$0xff] }
  0x1c   : > { %652 = vmatmul.mubr.msk.f32.vlgmr.msra.gmra.mrb[0].mxu0 %vm178_vm0, %v171_v4  ;;  %p754_p3 = pnand %p753_p2, %p747_p13 }
  0x1d   : > { %654 = vmatprep.mubr.msk.f32.mxu0 %vm178_vm0, %v172_v5 }
  0x20   : > { %655 = vmatmul.mubr.msk.f32.gmra.mrb[2].mxu0 %vm178_vm0, %v173_v6 }
  0x21   : > { %657 = vmatprep.mubr.msk.f32.mxu0 %vm178_vm0, %v174_v7 }
  0x24   : > { %658 = vmatmul.mubr.msk.f32.gmra.mrb[4].mxu0 %vm178_vm0, %v175_v8 }
  0xef   : > { %v653_v11 = vpop.f32.mrb[0].mxu0 }
  0xf0   : > { %v263_v12 = vpop.f32.mrb[1].mxu0 }
  0xf1   : > { %v686_v13 = vpack.c.bf16 %v653_v11, %v263_v12 }
  0xf3   : > { %v656_v14 = vpop.f32.mrb[2].mxu0  ;;  %687 = vmatpush3.bf16.msra.mxu1 %v686_v13 }
  0xf4   : > { %v273_v16 = vpop.f32.mrb[3].mxu0  ;;  %688 = vmatprep.subr.bf16.mxu1 %v808_v9 }
  0xf5   : > { %v689_v17 = vpack.c.bf16 %v656_v14, %v273_v16 }
  0xf6   : > { %665 = vmatmul.mubr.msk.f32.vlgmr.msra.gmra.mrb[0].mxu1 %vm178_vm0, %v169_v15 }
  0xf7   : > { %v659_v18 = vpop.f32.mrb[4].mxu0  ;;  %690 = vmatpush3.bf16.msra.mxu1 %v689_v17  ;;  %671 = vmatprep.mubr.msk.f32.mxu1 %vm809_vm1, %v810_v10 }
  0xf8   : > { %v283_v19 = vpop.f32.mrb[5].mxu0  ;;  %691 = vmatprep.subr.bf16.mxu1 %v808_v9 }
  0xf9   : > { %v692_v20 = vpack.c.bf16 %v659_v18, %v283_v19 }
  0xfa   : > { %672 = vmatmul.mubr.msk.f32.vlgmr.msra.gmra.mrb[2].mxu1 %vm178_vm0, %v169_v15 }
  0xfb   : > { %693 = vmatpush3.bf16.msra.mxu1 %v692_v20  ;;  %678 = vmatprep.mubr.msk.f32.mxu1 %vm809_vm1, %v810_v10 }
  0xfe   : > { %679 = vmatmul.mubr.msk.f32.vlgmr.msra.gmra.mrb[4].mxu1 %vm178_vm0, %v169_v15 }
 0x1c9   : > { %v361_v21 = vpop.f32.mrb[0].mxu1 }
 0x1ca   : > { %v365_v22 = vmul.f32 127.5, %v361_v21  ;;  %v666_v23 = vpop.f32.mrb[1].mxu1 }
 0x1cc   : > { %v366_v24 = vadd.f32 128.0, %v365_v22 }
 0x1cd   : > { %v440_v25 = vpop.f32.mrb[2].mxu1 }
 0x1ce   : > { %v367_v26 = vmax.f32 %v366_v24, 0.0  ;;  %v444_v27 = vmul.f32 127.5, %v440_v25  ;;  %v673_v28 = vpop.f32.mrb[3].mxu1 }
 0x1d0   : > { %v368_v29 = vmin.f32 %v367_v26, 255.0  ;;  %v445_v30 = vadd.f32 128.0, %v444_v27 }
 0x1d1   : > { %v519_v31 = vpop.f32.mrb[4].mxu1 }
 0x1d2   : > { %v696_v32 = vround.rtne.f32 %v368_v29  ;;  %v446_v33 = vmax.f32 %v445_v30, 0.0  ;;  %v523_v34 = vmul.f32 127.5, %v519_v31  ;;  %v680_v35 = vpop.f32.mrb[5].mxu1 }
 0x1d4   : > { %v620_v36 = vadd.f32 -122.770935, %v696_v32  ;;  %v447_v37 = vmin.f32 %v446_v33, 255.0  ;;  %v524_v38 = vadd.f32 128.0, %v523_v34 }
 0x1d6   : > { %v371_v39 = vmul.f32 0.014598426, %v620_v36  ;;  %v697_v40 = vround.rtne.f32 %v447_v37  ;;  %v525_v41 = vmax.f32 %v524_v38, 0.0 }
 0x1d8   : > { %373 = vst.msk [vmem:[%s163_s10] sm:$0xff] %vm372_vm2, %v371_v39  ;;  %v622_v42 = vadd.f32 -116.74601, %v697_v40  ;;  %v526_v43 = vmin.f32 %v525_v41, 255.0 }
 0x1da   : > { %v450_v44 = vmul.f32 0.015007769, %v622_v42  ;;  %v698_v45 = vround.rtne.f32 %v526_v43 }
 0x1dc   : > { %623 = vst.msk [vmem:[%s163_s10 + $0x8] sm:$0xff] %vm372_vm2, %v450_v44  ;;  %v625_v46 = vadd.f32 -104.093735, %v698_v45 }
 0x1de   : > { %v529_v47 = vmul.f32 0.014220065, %v625_v46 }
 0x1e0   : > { %626 = vst.msk [vmem:[%s163_s10 + $0x10] sm:$0xff] %vm372_vm2, %v529_v47 }
 0x1e1   : > { %757 = shalt.err (!%p754_p3)
}
 0x1e2   : > { %s758_s29 = scalar_lea.hbm %s917_s24, 384  ;;  %s762_s5 = scalar_lea.hbm %s968_s3, 768 }
 0x1e3   : > { %p759_p4 = scmp.ne.s32.totalorder %s917_s24, %s758_s29  ;;  %p763_p9 = scmp.lt.u32.totalorder %s917_s24, %s968_s3 }
 0x1e4   : > { %p764_p10 = scmp.lt.u32.totalorder %s762_s5, %s758_s29  ;;  %p766_p12 = scmp.lt.u32.totalorder %s758_s29, %s917_s24 }
 0x1e5   : > { %p760_p7 = pnand %p759_p4, %p872_p5 }
 0x1e6   : > { %p765_p11 = por %p764_p10, %p763_p9 }
 0x1e7   : > { %p761_p8 = pneg %p760_p7 }
 0x1e8   : > { %p767_p13 = por %p766_p12, %p765_p11 }
 0x1ea   : > { %p768_p0 = pnand %p767_p13, %p761_p8 }
 0x1ec   : > { %771 = shalt.err (!%p768_p0)
}
 0x1ed   : > { %s812_s8 = smov 128   ;;  %s813_s9 = smov 8  }
 0x1ee   : > { %700 = dma.vmem_to_hbm [thread:$0]  (%p872_p5), %s919_s17, 384, %s917_s24, %s924_s16, %s812_s8, %s812_s8, %s813_s9  }
 0x1ef PF: > { %p706_p1 = scmp.ge.s32.totalorder %s806_s15, 2  ;;  %s561_s10 = sand.u32 1, %s794_s12  }
 0x1f0   : > { %s562_s11 = scalar_lea.sflag [#allocation3], %s561_s10 }
 0x1f1   : > { %p703_p2 = pnand %p706_p1, %p876_p6 }
 0x1f3   : > { %789 = dma.done.wait (!%p703_p2), %s562_s11, 384  }
 0x1f4   : > { %791 = vsyncadd (!%p703_p2), %s562_s11, 4294966912  ;;  %p13_p3 = scmp.ge.s32.totalorder %s859_s18, 4   ;;  %s971_s12 = smov %s798_s13 }
 0x1f5   : > { %s972_s13 = smov %s802_s14  ;;  %s973_s14 = smov %s870_s21 }
 0x1f6   : > { %s974_s15 = smov %s859_s18  ;;  %15 = sbr.rel (!%p13_p3) target bundleno = 3 (0x3), region = 69 }
 0x1fd   :  { %567 = vsyncpa [#allocation3], 1 }
 0x1fe   :  { %569 = vsyncpa [#allocation3 + $0x1], 1 }

</bundles_post_ra>
